<compile_context>
chip_gen: v7x
topology: tpu7x:2x2x1
jax: 0.10.0
libtpu: 0.0.40
codegen_flags: <defaults>
</compile_context>

<pallas_src>
import jax
import jax.numpy as jnp
from jax import lax
from jax.experimental import pallas as pl
from jax.experimental.pallas import tpu as pltpu

N, C_IN, H, W = 2, 4, 16, 16
C_OUT, KH, KW = 8, 3, 3

WP = 32                    # padded width: 1 left conv-pad + 15 right zeros (lane friendly)
HP = H + 3                 # 1 top conv-pad + 2 bottom zeros (covers the dh=2 tap overrun)
FLAT = HP * WP             # flattened padded spatial extent per (n, c)        = 608
OUT_FLAT = H * WP          # flattened compute window per batch element        = 512
K_TAPS = KH * KW * C_IN    # contraction size of the fused matmul              = 36


def fused_conv_relu_kernel(x_ref, w_ref, b_ref, o_ref):
    # x_ref: [C_IN, N*FLAT]        bf16  (all batch elements, zero-padded, flattened)
    # w_ref: [C_OUT, K_TAPS]       bf16  ((dh, dw, ci)-ordered columns)
    # b_ref: [C_OUT, 1]            f32
    # o_ref: [C_OUT, N*OUT_FLAT]   f32   (lane-dense: 1024 = 8 * 128)
    x = x_ref[...]
    # Fused im2col: stack the 9 statically-shifted windows of each batch
    # element along sublanes -> [K_TAPS, N*OUT_FLAT] bf16 (~72 KiB in VMEM).
    cols = []
    for n in range(N):
        base = n * FLAT
        rows = []
        for dh in range(KH):
            for dw in range(KW):
                off = base + dh * WP + dw                     # static offset
                rows.append(x[:, off:off + OUT_FLAT])         # [C_IN, OUT_FLAT]
        cols.append(jnp.concatenate(rows, axis=0))            # [K_TAPS, OUT_FLAT]
    stacked = jnp.concatenate(cols, axis=1)                   # [K_TAPS, N*OUT_FLAT]

    # Single MXU matmul: [8, 36] x [36, 1024], f32 accumulation.
    acc = jnp.dot(w_ref[...], stacked, preferred_element_type=jnp.float32)
    acc = acc + b_ref[...]                                    # f32 bias, one add pass
    o_ref[...] = jnp.maximum(acc, 0.0).astype(o_ref.dtype)


def model_wrapper_forward(x, weight, bias):
    """Equivalent of ModelWrapper(model)(x) with model = Conv2d(4->8,3x3,p=1)+ReLU.

    x:      [N, C_IN, H, W]  float32 (NCHW)
    weight: [C_OUT, C_IN, KH, KW]
    bias:   [C_OUT]
    returns [N, C_OUT, H, W] float32 (NCHW)
    """
    n = x.shape[0]
    # Single host-side pad (top=1, bottom=2, left=1, right=WP-W-1), batch-fused
    # layout [C_IN, N*FLAT], cast to bf16 once (halves the input DMA bytes).
    xp = jnp.pad(x, ((0, 0), (0, 0), (1, 2), (1, WP - W - 1)))        # [N, C_IN, HP, WP]
    x_flat = xp.transpose(1, 0, 2, 3).reshape(C_IN, n * FLAT).astype(jnp.bfloat16)
    # Weights to 2-D (dh, dw, ci)-ordered columns, bf16 on the host.
    w2d = weight.transpose(0, 2, 3, 1).reshape(C_OUT, K_TAPS).astype(jnp.bfloat16)
    b2 = bias.reshape(C_OUT, 1).astype(jnp.float32)

    out_flat = pl.pallas_call(
        fused_conv_relu_kernel,
        out_shape=jax.ShapeDtypeStruct((C_OUT, n * OUT_FLAT), jnp.float32),
        grid=(1,),                                                     # one step for everything
        in_specs=[
            pl.BlockSpec((C_IN, n * FLAT), lambda i: (0, 0)),
            pl.BlockSpec((C_OUT, K_TAPS), lambda i: (0, 0)),
            pl.BlockSpec((C_OUT, 1), lambda i: (0, 0)),
        ],
        out_specs=pl.BlockSpec((C_OUT, n * OUT_FLAT), lambda i: (0, 0)),
    )(x_flat, w2d, b2)

    # [C_OUT, N*H*WP] -> [C_OUT, N, H, WP] -> [N, C_OUT, H, WP] -> keep W valid cols.
    return out_flat.reshape(C_OUT, n, H, WP).transpose(1, 0, 2, 3)[:, :, :, :W]


def reference_forward(x, weight, bias):
    """Plain-JAX reference (lax conv) for the correctness check."""
    y = lax.conv_general_dilated(
        x, weight, window_strides=(1, 1), padding="SAME",
        dimension_numbers=("NCHW", "OIHW", "NCHW"),
        precision=lax.Precision.HIGHEST)
    return jnp.maximum(y + bias.reshape(1, C_OUT, 1, 1), 0.0)


if __name__ == "__main__":
    key = jax.random.PRNGKey(0)
    kx, kw, kb = jax.random.split(key, 3)

    x = jax.random.normal(kx, (N, C_IN, H, W), dtype=jnp.float32)
    weight = 0.1 * jax.random.normal(kw, (C_OUT, C_IN, KH, KW), dtype=jnp.float32)
    bias = 0.1 * jax.random.normal(kb, (C_OUT,), dtype=jnp.float32)

    out = jax.jit(model_wrapper_forward)(x, weight, bias)
    out = jax.block_until_ready(out)

    # Reference sees the same bf16-rounded operands the kernel feeds the MXU.
    x_r = x.astype(jnp.bfloat16).astype(jnp.float32)
    w_r = weight.astype(jnp.bfloat16).astype(jnp.float32)
    ref = reference_forward(x_r, w_r, bias)

    assert out.shape == (N, C_OUT, H, W)
    assert jnp.allclose(out, ref, atol=1e-3, rtol=1e-3), \
        float(jnp.max(jnp.abs(out - ref)))

    print("KERNEL_OK")
</pallas_src>

<mosaic_0001>
module attributes {stable_mosaic.version = 11 : i64} {
  func.func @fused_conv_relu_kernel(%arg0: i32, %arg1: memref<4x1216xbf16, #tpu.memory_space<vmem>>, %arg2: memref<8x36xbf16, #tpu.memory_space<vmem>>, %arg3: memref<8x1xf32, #tpu.memory_space<vmem>>, %arg4: memref<8x1024xf32, #tpu.memory_space<vmem>>) attributes {dimension_semantics = [#tpu.dimension_semantics<arbitrary>], iteration_bounds = array<i64: 1>, scalar_prefetch = 0 : i64, scratch_operands = 0 : i64, tpu.core_type = #tpu.core_type<tc>, window_params = [{pipeline_mode = #tpu.pipeline_mode<synchronous>, transform_indices = @transform_0, window_bounds = array<i64: 4, 1216>}, {pipeline_mode = #tpu.pipeline_mode<synchronous>, transform_indices = @transform_1, window_bounds = array<i64: 8, 36>}, {pipeline_mode = #tpu.pipeline_mode<synchronous>, transform_indices = @transform_2, window_bounds = array<i64: 8, 1>}, {pipeline_mode = #tpu.pipeline_mode<synchronous>, transform_indices = @transform_3, window_bounds = array<i64: 8, 1024>}]} {
    %c0 = arith.constant 0 : index
    %c0_0 = arith.constant 0 : index
    %0 = vector.load %arg1[%c0, %c0_0] : memref<4x1216xbf16, #tpu.memory_space<vmem>>, vector<4x1216xbf16>
    %1 = vector.extract_strided_slice %0 {offsets = [0, 0], sizes = [4, 512], strides = [1, 1]} : vector<4x1216xbf16> to vector<4x512xbf16>
    %2 = vector.extract_strided_slice %0 {offsets = [0, 1], sizes = [4, 512], strides = [1, 1]} : vector<4x1216xbf16> to vector<4x512xbf16>
    %3 = vector.extract_strided_slice %0 {offsets = [0, 2], sizes = [4, 512], strides = [1, 1]} : vector<4x1216xbf16> to vector<4x512xbf16>
    %4 = vector.extract_strided_slice %0 {offsets = [0, 32], sizes = [4, 512], strides = [1, 1]} : vector<4x1216xbf16> to vector<4x512xbf16>
    %5 = vector.extract_strided_slice %0 {offsets = [0, 33], sizes = [4, 512], strides = [1, 1]} : vector<4x1216xbf16> to vector<4x512xbf16>
    %6 = vector.extract_strided_slice %0 {offsets = [0, 34], sizes = [4, 512], strides = [1, 1]} : vector<4x1216xbf16> to vector<4x512xbf16>
    %7 = vector.extract_strided_slice %0 {offsets = [0, 64], sizes = [4, 512], strides = [1, 1]} : vector<4x1216xbf16> to vector<4x512xbf16>
    %8 = vector.extract_strided_slice %0 {offsets = [0, 65], sizes = [4, 512], strides = [1, 1]} : vector<4x1216xbf16> to vector<4x512xbf16>
    %9 = vector.extract_strided_slice %0 {offsets = [0, 66], sizes = [4, 512], strides = [1, 1]} : vector<4x1216xbf16> to vector<4x512xbf16>
    %10 = tpu.concatenate %1, %2, %3, %4, %5, %6, %7, %8, %9 in 0 : vector<4x512xbf16>, vector<4x512xbf16>, vector<4x512xbf16>, vector<4x512xbf16>, vector<4x512xbf16>, vector<4x512xbf16>, vector<4x512xbf16>, vector<4x512xbf16>, vector<4x512xbf16> -> vector<36x512xbf16>
    %11 = vector.extract_strided_slice %0 {offsets = [0, 608], sizes = [4, 512], strides = [1, 1]} : vector<4x1216xbf16> to vector<4x512xbf16>
    %12 = vector.extract_strided_slice %0 {offsets = [0, 609], sizes = [4, 512], strides = [1, 1]} : vector<4x1216xbf16> to vector<4x512xbf16>
    %13 = vector.extract_strided_slice %0 {offsets = [0, 610], sizes = [4, 512], strides = [1, 1]} : vector<4x1216xbf16> to vector<4x512xbf16>
    %14 = vector.extract_strided_slice %0 {offsets = [0, 640], sizes = [4, 512], strides = [1, 1]} : vector<4x1216xbf16> to vector<4x512xbf16>
    %15 = vector.extract_strided_slice %0 {offsets = [0, 641], sizes = [4, 512], strides = [1, 1]} : vector<4x1216xbf16> to vector<4x512xbf16>
    %16 = vector.extract_strided_slice %0 {offsets = [0, 642], sizes = [4, 512], strides = [1, 1]} : vector<4x1216xbf16> to vector<4x512xbf16>
    %17 = vector.extract_strided_slice %0 {offsets = [0, 672], sizes = [4, 512], strides = [1, 1]} : vector<4x1216xbf16> to vector<4x512xbf16>
    %18 = vector.extract_strided_slice %0 {offsets = [0, 673], sizes = [4, 512], strides = [1, 1]} : vector<4x1216xbf16> to vector<4x512xbf16>
    %19 = vector.extract_strided_slice %0 {offsets = [0, 674], sizes = [4, 512], strides = [1, 1]} : vector<4x1216xbf16> to vector<4x512xbf16>
    %20 = tpu.concatenate %11, %12, %13, %14, %15, %16, %17, %18, %19 in 0 : vector<4x512xbf16>, vector<4x512xbf16>, vector<4x512xbf16>, vector<4x512xbf16>, vector<4x512xbf16>, vector<4x512xbf16>, vector<4x512xbf16>, vector<4x512xbf16>, vector<4x512xbf16> -> vector<36x512xbf16>
    %21 = tpu.concatenate %10, %20 in 1 : vector<36x512xbf16>, vector<36x512xbf16> -> vector<36x1024xbf16>
    %c0_1 = arith.constant 0 : index
    %c0_2 = arith.constant 0 : index
    %22 = vector.load %arg2[%c0_1, %c0_2] : memref<8x36xbf16, #tpu.memory_space<vmem>>, vector<8x36xbf16>
    %cst = arith.constant dense<0.000000e+00> : vector<8x1024xf32>
    %23 = tpu.matmul %22, %21, %cst {dimension_numbers = #tpu.dot_dimension_numbers<[1], [0], [0], [1], [0, 0, 1, 1], [], []>} : vector<8x36xbf16>, vector<36x1024xbf16>, vector<8x1024xf32> -> vector<8x1024xf32>
    %c0_3 = arith.constant 0 : index
    %c0_4 = arith.constant 0 : index
    %24 = vector.load %arg3[%c0_3, %c0_4] : memref<8x1xf32, #tpu.memory_space<vmem>>, vector<8x1xf32>
    %25 = vector.broadcast %24 : vector<8x1xf32> to vector<8x1024xf32>
    %26 = arith.addf %23, %25 : vector<8x1024xf32>
    %cst_5 = arith.constant 0.000000e+00 : f32
    %27 = vector.broadcast %cst_5 : f32 to vector<8x1024xf32>
    %28 = arith.maximumf %26, %27 : vector<8x1024xf32>
    %c0_6 = arith.constant 0 : index
    %c0_7 = arith.constant 0 : index
    %29 = vector.load %arg4[%c0_6, %c0_7] : memref<8x1024xf32, #tpu.memory_space<vmem>>, vector<8x1024xf32>
    tpu.vector_store %arg4[%c0_6, %c0_7], %28 {strides = array<i32>} : memref<8x1024xf32, #tpu.memory_space<vmem>>, vector<8x1024xf32>,
    return
  }
  func.func @transform_0(%arg0: i32) -> (i32, i32) {
    %c0_i32 = arith.constant 0 : i32
    %c0_i32_0 = arith.constant 0 : i32
    %c0_i32_1 = arith.constant 0 : i32
    return %c0_i32, %c0_i32_0 : i32, i32
  }
  func.func @transform_1(%arg0: i32) -> (i32, i32) {
    %c0_i32 = arith.constant 0 : i32
    %c0_i32_0 = arith.constant 0 : i32
    %c0_i32_1 = arith.constant 0 : i32
    return %c0_i32, %c0_i32_0 : i32, i32
  }
  func.func @transform_2(%arg0: i32) -> (i32, i32) {
    %c0_i32 = arith.constant 0 : i32
    %c0_i32_0 = arith.constant 0 : i32
    %c0_i32_1 = arith.constant 0 : i32
    return %c0_i32, %c0_i32_0 : i32, i32
  }
  func.func @transform_3(%arg0: i32) -> (i32, i32) {
    %c0_i32 = arith.constant 0 : i32
    %c0_i32_0 = arith.constant 0 : i32
    %c0_i32_1 = arith.constant 0 : i32
    return %c0_i32, %c0_i32_0 : i32, i32
  }
}

</mosaic_0001>

<bundles_post_ra>
// kernel: model_wrapper_forward.1
= control target key start
LH: loop header
LB: loop body
LE: loop exit
PB: predicated region body
PF: predicated region fallthrough
CT: control target
= control target key end

     0   :  { %v23_v0 = vlaneseq  ;;  %v765_v2 = vmov 1983009808   ;;  %s766_s18 = smov 127   ;;  %s768_s19 = smov 96   ;;  %vm71_vm0 = vcmask 1039360   ;;  %vm89_vm1 = vcmask 1031168   ;;  %s1228_s0 = inlined_call_operand.vmem [shape: bf16[4,1216], index: 0, kind: input, shape index: {}]   ;;  %s1229_s2 = inlined_call_operand.vmem [shape: f32[8,1], index: 2, kind: input, shape index: {}]   ;;  %s1230_s1 = inlined_call_operand.vmem [shape: bf16[8,36], index: 1, kind: input, shape index: {}]   ;;  %s1231_s3 = inlined_call_operand.vmem [shape: f32[8,1024], index: 3, kind: output, shape index: {}]  }
   0x1   :  { %v17_v1 = vld [vmem:[%s1228_s0 + $0x10] sm:$0xf]  ;;  %v21_v3 = vunpack.c.l.s4 %v765_v2  ;;  %v15_v4 = vld [vmem:[%s1228_s0] sm:$0xff]  ;;  %v16_v9 = vld [vmem:[%s1228_s0 + $0x8] sm:$0xff]  ;;  %s767_s0 = smov 126   ;;  %s769_s20 = smov 95  }
   0x2   :  { %v24_v5 = vshrl.u32 %v23_v0, 7  ;;  %v272_v7 = vcombine.low %v17_v1, %v17_v1  ;;  %v19_v8 = vcombine.high %v15_v4, %v15_v4  ;;  %v37_v10 = vcombine.low %v15_v4, %v15_v4  ;;  %s770_s21 = smov 94   ;;  %s771_s22 = smov 64  }
   0x3   :  { %v22_v6 = vunpack.c.0.s8 %v21_v3  ;;  %v46_v12 = vcombine.low %v16_v9, %v16_v9  ;;  %v254_v18 = vcombine.high %v16_v9, %v16_v9  ;;  %s772_s23 = smov 63   ;;  %s773_s24 = smov 62   ;;  %vm106_vm2 = vcmask 785408  }
   0x4   :  { %vm199_vm3 = vcmask 1043456   ;;  %vm186_vm4 = vcmask 1041408   ;;  %vm208_vm5 = vcmask 1045504   ;;  %v774_v59 = vmov 0   ;;  %s775_s25 = smov 32  }
   0x5   :  { %v25_v11 = vsub.s32 %v22_v6, %v24_v5  ;;  %588 = vmatprep.mubr.bf16.mxu0 %v774_v59  ;;  %629 = vmatprep.mubr.bf16.mxu1 %v774_v59  ;;  %vm136_vm6 = vcmask 769024   ;;  %vm151_vm7 = vcmask 523264   ;;  %vm121_vm8 = vcmask 777216  }
   0x6   :  { %759 = vset.pattern.permute.xlu0 %v774_v59  ;;  %vm166_vm9 = vcmask 515072   ;;  %vm181_vm10 = vcmask 506880   ;;  %vm528_vm11 = vcmask 293888   ;;  %vm500_vm12 = vcmask 261120  }
   0x7   :  { %v279_v13 = vrot.slane %v272_v7, %v25_v11  ;;  %v805_v14 = vrot.slane %v15_v4, %v25_v11  ;;  %v807_v15 = vrot.slane %v19_v8, %v25_v11  ;;  %v809_v16 = vrot.slane %v16_v9, %v25_v11 }
   0x8   :  { %v811_v17 = vrot.slane %v37_v10, %v25_v11  ;;  %v816_v19 = vrot.slane %v46_v12, %v25_v11  ;;  %v818_v20 = vrot.slane %v254_v18, %v25_v11  ;;  %v830_v23 = vrot.slane %v17_v1, %v25_v11 }
   0x9   :  { %286 = vrot.lane.b32.xlu1 %v279_v13, %s766_s18  ;;  %282 = vrot.lane.b32.xlu0 %v809_v16, %s766_s18  ;;  %v826_v21 = vcombine.high %v809_v16, %v809_v16  ;;  %v842_v25 = vcombine.low %v809_v16, %v809_v16  ;;  %v306_v27 = vcombine.low %v279_v13, %v279_v13 }
   0xa   :  { %v271_v22 = vcombine.high %v816_v19, %v816_v19  ;;  %v292_v24 = vcombine.low %v818_v20, %v818_v20  ;;  %v293_v26 = vcombine.low %v830_v23, %v830_v23  ;;  %v862_v28 = vcombine.high %v818_v20, %v818_v20 }
   0xb   :  { %v318_v29 = vcombine.high %v830_v23, %v830_v23  ;;  %v333_v30 = vcombine.high %v279_v13, %v279_v13  ;;  %v45_v31 = vcombine.high %v811_v17, %v811_v17  ;;  %v908_v32 = vcombine.high %v805_v14, %v805_v14 }
   0xc   :  { %v77_v33 = vcombine.low %v807_v15, %v807_v15  ;;  %v76_v34 = vcombine.low %v805_v14, %v805_v14  ;;  %v94_v35 = vcombine.low %v811_v17, %v811_v17  ;;  %v95_v36 = vcombine.low %v816_v19, %v816_v19 }
   0xd   :  { %294 = vrot.lane.b32.xlu1 %v809_v16, %s767_s0  ;;  %69 = vrot.lane.b32.xlu0 %v816_v19, %s766_s18  ;;  %v943_v37 = vcombine.high %v807_v15, %v807_v15 }
  0x11   :  { %284 = vrot.lane.b32.xlu1 %v826_v21, %s766_s18  ;;  %280 = vrot.lane.b32.xlu0 %v271_v22, %s766_s18 }
  0x15   :  { %298 = vrot.lane.b32.xlu1 %v818_v20, %s767_s0  ;;  %296 = vrot.lane.b32.xlu0 %v292_v24, %s767_s0 }
  0x19   :  { %87 = vrot.lane.b32.xlu1 %v842_v25, %s767_s0  ;;  %300 = vrot.lane.b32.xlu0 %v293_v26, %s767_s0 }
  0x1d   :  { %309 = vrot.lane.b32.xlu1 %v842_v25, %s768_s19  ;;  %307 = vrot.lane.b32.xlu0 %v816_v19, %s768_s19 }
  0x21   :  { %313 = vrot.lane.b32.xlu1 %v306_v27, %s768_s19  ;;  %311 = vrot.lane.b32.xlu0 %v809_v16, %s768_s19 }
  0x25   :  { %321 = vrot.lane.b32.xlu1 %v818_v20, %s769_s20  ;;  %319 = vrot.lane.b32.xlu0 %v826_v21, %s769_s20 }
  0x29   :  { %325 = vrot.lane.b32.xlu1 %v830_v23, %s769_s20  ;;  %323 = vrot.lane.b32.xlu0 %v862_v28, %s769_s20 }
  0x2d   :  { %334 = vrot.lane.b32.xlu1 %v271_v22, %s770_s21  ;;  %327 = vrot.lane.b32.xlu0 %v318_v29, %s769_s20 }
  0x31   :  { %338 = vrot.lane.b32.xlu1 %v826_v21, %s770_s21  ;;  %336 = vrot.lane.b32.xlu0 %v809_v16, %s770_s21 }
  0x35   :  { %342 = vrot.lane.b32.xlu1 %v333_v30, %s770_s21  ;;  %340 = vrot.lane.b32.xlu0 %v279_v13, %s770_s21 }
  0x39   :  { %350 = vrot.lane.b32.xlu1 %v292_v24, %s771_s22  ;;  %348 = vrot.lane.b32.xlu0 %v809_v16, %s771_s22 }
  0x3d   :  { %354 = vrot.lane.b32.xlu1 %v293_v26, %s771_s22  ;;  %352 = vrot.lane.b32.xlu0 %v818_v20, %s771_s22 }
  0x41   :  { %362 = vrot.lane.b32.xlu1 %v816_v19, %s772_s23  ;;  %356 = vrot.lane.b32.xlu0 %v830_v23, %s771_s22 }
  0x45   :  { %366 = vrot.lane.b32.xlu1 %v809_v16, %s772_s23  ;;  %364 = vrot.lane.b32.xlu0 %v842_v25, %s772_s23 }
  0x49   :  { %370 = vrot.lane.b32.xlu1 %v279_v13, %s772_s23  ;;  %368 = vrot.lane.b32.xlu0 %v306_v27, %s772_s23 }
  0x4d   :  { %378 = vrot.lane.b32.xlu1 %v818_v20, %s773_s24  ;;  %376 = vrot.lane.b32.xlu0 %v826_v21, %s773_s24 }
  0x51   :  { %382 = vrot.lane.b32.xlu1 %v830_v23, %s773_s24  ;;  %380 = vrot.lane.b32.xlu0 %v862_v28, %s773_s24 }
  0x55   :  { %384 = vrot.lane.b32.xlu0 %v318_v29, %s773_s24  ;;  %63 = vrot.lane.b32.xlu1 %v45_v31, %s766_s18 }
  0x59   :  { %65 = vrot.lane.b32.xlu0 %v805_v14, %s766_s18  ;;  %67 = vrot.lane.b32.xlu1 %v908_v32, %s766_s18 }
  0x5d   :  { %61 = vrot.lane.b32.xlu0 %v811_v17, %s766_s18  ;;  %81 = vrot.lane.b32.xlu1 %v805_v14, %s767_s0 }
  0x61   :  { %85 = vrot.lane.b32.xlu1 %v807_v15, %s767_s0  ;;  %83 = vrot.lane.b32.xlu0 %v77_v33, %s767_s0 }
  0x65   :  { %98 = vrot.lane.b32.xlu1 %v811_v17, %s768_s19  ;;  %79 = vrot.lane.b32.xlu0 %v76_v34, %s767_s0 }
  0x69   :  { %102 = vrot.lane.b32.xlu1 %v805_v14, %s768_s19  ;;  %100 = vrot.lane.b32.xlu0 %v76_v34, %s768_s19 }
  0x6d   :  { %96 = vrot.lane.b32.xlu1 %v94_v35, %s768_s19  ;;  %104 = vrot.lane.b32.xlu0 %v95_v36, %s768_s19 }
  0x71   :  { %115 = vrot.lane.b32.xlu1 %v807_v15, %s769_s20  ;;  %113 = vrot.lane.b32.xlu0 %v908_v32, %s769_s20 }
  0x75   :  { %119 = vrot.lane.b32.xlu1 %v809_v16, %s769_s20  ;;  %117 = vrot.lane.b32.xlu0 %v943_v37, %s769_s20 }
  0x79   :  { %130 = vrot.lane.b32.xlu1 %v805_v14, %s770_s21  ;;  %128 = vrot.lane.b32.xlu0 %v45_v31, %s770_s21 }
  0x7b   :  { %v952_v38 = vpop.permute.xlu1 %286  ;;  %v283_v39 = vpop.permute.xlu0 %282 }
  0x7d   :  { %134 = vrot.lane.b32.xlu1 %v816_v19, %s770_s21  ;;  %132 = vrot.lane.b32.xlu0 %v908_v32, %s770_s21 }
  0x7f   :  { %v958_v40 = vpop.permute.xlu1 %294  ;;  %v960_v41 = vpop.permute.xlu0 %69 }
  0x81   :  { %126 = vrot.lane.b32.xlu1 %v811_v17, %s770_s21  ;;  %111 = vrot.lane.b32.xlu0 %v805_v14, %s769_s20 }
  0x83   :  { %v285_v42 = vpop.permute.xlu1 %284  ;;  %v281_v43 = vpop.permute.xlu0 %280 }
  0x84   :  { %v289_v54 = vsel %vm71_vm0, %v281_v43, %v283_v39  ;;  %v291_v61 = vsel %vm71_vm0, %v285_v42, %v952_v38  ;;  %v290_v1 = vsel %vm71_vm0, %v283_v39, %v285_v42  ;;  %v288_v9 = vsel %vm71_vm0, %v960_v41, %v281_v43 }
  0x85   :  { %145 = vrot.lane.b32.xlu1 %v77_v33, %s771_s22  ;;  %143 = vrot.lane.b32.xlu0 %v805_v14, %s771_s22  ;;  %v395_v60 = vsel %vm186_vm4, %v826_v21, %v289_v54  ;;  %v401_v6 = vsel %vm186_vm4, %v862_v28, %v291_v61  ;;  %v398_v8 = vsel %vm186_vm4, %v818_v20, %v290_v1 }
  0x86   :  { %v392_v20 = vsel %vm186_vm4, %v809_v16, %v288_v9  ;;  %v404_v21 = vsel %vm186_vm4, %v830_v23, %v952_v38 }
  0x87   :  { %v299_v44 = vpop.permute.xlu1 %298  ;;  %v297_v45 = vpop.permute.xlu0 %296 }
  0x88   :  { %v303_v57 = vsel %vm89_vm1, %v958_v40, %v297_v45  ;;  %v304_v4 = vsel %vm89_vm1, %v297_v45, %v299_v44 }
  0x89   :  { %149 = vrot.lane.b32.xlu1 %v842_v25, %s771_s22  ;;  %147 = vrot.lane.b32.xlu0 %v807_v15, %s771_s22  ;;  %v408_v0 = vsel %vm199_vm3, %v395_v60, %v303_v57  ;;  %v410_v18 = vsel %vm199_vm3, %v398_v8, %v304_v4 }
  0x8b   :  { %v973_v46 = vpop.permute.xlu1 %87  ;;  %v975_v47 = vpop.permute.xlu0 %300 }
  0x8c   :  { %v305_v2 = vsel %vm89_vm1, %v299_v44, %v975_v47  ;;  %v302_v13 = vsel %vm89_vm1, %v973_v46, %v958_v40  ;;  %v414_v26 = vsel %vm199_vm3, %v404_v21, %v975_v47 }
  0x8d   :  { %158 = vrot.lane.b32.xlu1 %v811_v17, %s772_s23  ;;  %141 = vrot.lane.b32.xlu0 %v76_v34, %s771_s22  ;;  %v412_v12 = vsel %vm199_vm3, %v401_v6, %v305_v2  ;;  %v406_v25 = vsel %vm199_vm3, %v392_v20, %v302_v13 }
  0x8f   :  { %v310_v48 = vpop.permute.xlu1 %309  ;;  %v308_v49 = vpop.permute.xlu0 %307 }
  0x90   :  { %v315_v58 = vsel %vm106_vm2, %v308_v49, %v310_v48  ;;  %v416_v27 = vsel %vm208_vm5, %v406_v25, %v308_v49  ;;  %v522_v25 = vld [vmem:[%s1229_s2] sm:$0xff] }
  0x91   :  { %162 = vrot.lane.b32.xlu1 %v805_v14, %s772_s23  ;;  %160 = vrot.lane.b32.xlu0 %v76_v34, %s772_s23  ;;  %v418_v3 = vsel %vm208_vm5, %v408_v0, %v315_v58 }
  0x93   :  { %v314_v50 = vpop.permute.xlu1 %313  ;;  %v312_v51 = vpop.permute.xlu0 %311 }
  0x94   :  { %v317_v5 = vsel %vm106_vm2, %v312_v51, %v314_v50  ;;  %v316_v7 = vsel %vm106_vm2, %v310_v48, %v312_v51  ;;  %v424_v28 = vsel %vm208_vm5, %v414_v26, %v314_v50 }
  0x95   :  { %156 = vrot.lane.b32.xlu1 %v94_v35, %s772_s23  ;;  %164 = vrot.lane.b32.xlu0 %v95_v36, %s772_s23  ;;  %v422_v17 = vsel %vm208_vm5, %v412_v12, %v317_v5  ;;  %v420_v19 = vsel %vm208_vm5, %v410_v18, %v316_v7 }
  0x97   :  { %v985_v52 = vpop.permute.xlu1 %321  ;;  %v987_v53 = vpop.permute.xlu0 %319 }
  0x98   :  { %v329_v39 = vsel %vm121_vm8, %v987_v53, %v985_v52 }
  0x99   :  { %173 = vrot.lane.b32.xlu1 %v908_v32, %s773_s24  ;;  %171 = vrot.lane.b32.xlu0 %v805_v14, %s773_s24 }
  0x9b   :  { %v994_v55 = vpop.permute.xlu1 %325  ;;  %v996_v56 = vpop.permute.xlu0 %323 }
  0x9c   :  { %v330_v40 = vsel %vm121_vm8, %v985_v52, %v996_v56  ;;  %v331_v61 = vsel %vm121_vm8, %v996_v56, %v994_v55 }
  0x9d   :  { %177 = vrot.lane.b32.xlu1 %v943_v37, %s773_s24  ;;  %175 = vrot.lane.b32.xlu0 %v807_v15, %s773_s24 }
  0x9f   :  { %v1011_v62 = vpop.permute.xlu1 %334  ;;  %v1013_v63 = vpop.permute.xlu0 %327 }
  0xa0   :  { %v332_v0 = vsel %vm121_vm8, %v994_v55, %v1013_v63  ;;  %v427_v8 = vsel %vm186_vm4, %v987_v53, %v1011_v62 }
  0xa1   :  { %472 = vrot.lane.b32.xlu1 %v418_v3, %s775_s25  ;;  %179 = vrot.lane.b32.xlu0 %v809_v16, %s773_s24 }
  0xa3   :  { %v339_v10 = vpop.permute.xlu1 %338  ;;  %v337_v11 = vpop.permute.xlu0 %336 }
  0xa4   :  { %v344_v34 = vsel %vm136_vm6, %v1011_v62, %v337_v11  ;;  %v345_v35 = vsel %vm136_vm6, %v337_v11, %v339_v10 }
  0xa5   :  { %476 = vrot.lane.b32.xlu1 %v422_v17, %s775_s25  ;;  %474 = vrot.lane.b32.xlu0 %v420_v19, %s775_s25  ;;  %v430_v42 = vsel %vm186_vm4, %v329_v39, %v344_v34  ;;  %v433_v43 = vsel %vm186_vm4, %v330_v40, %v345_v35 }
  0xa7   :  { %v343_v22 = vpop.permute.xlu1 %342  ;;  %v341_v24 = vpop.permute.xlu0 %340 }
  0xa8   :  { %v346_v44 = vsel %vm136_vm6, %v339_v10, %v341_v24  ;;  %v347_v45 = vsel %vm136_vm6, %v341_v24, %v343_v22 }
  0xa9   :  { %470 = vrot.lane.b32.xlu1 %v416_v27, %s775_s25  ;;  %478 = vrot.lane.b32.xlu0 %v424_v28, %s775_s25  ;;  %v436_v1 = vsel %vm186_vm4, %v331_v61, %v346_v44  ;;  %v439_v2 = vsel %vm186_vm4, %v332_v0, %v347_v45 }
  0xab   :  { %v351_v16 = vpop.permute.xlu1 %350  ;;  %v349_v29 = vpop.permute.xlu0 %348 }
  0xac   :  { %v358_v36 = vsel %vm151_vm7, %v349_v29, %v351_v16  ;;  %v441_v11 = vsel %vm199_vm3, %v427_v8, %v349_v29 }
  0xad   :  { %v443_v54 = vsel %vm199_vm3, %v430_v42, %v358_v36 }
  0xaf   :  { %v355_v30 = vpop.permute.xlu1 %354  ;;  %v353_v31 = vpop.permute.xlu0 %352 }
  0xb0   :  { %v359_v38 = vsel %vm151_vm7, %v351_v16, %v353_v31  ;;  %v360_v52 = vsel %vm151_vm7, %v353_v31, %v355_v30 }
  0xb1   :  { %v445_v51 = vsel %vm199_vm3, %v433_v43, %v359_v38  ;;  %v447_v7 = vsel %vm199_vm3, %v436_v1, %v360_v52 }
  0xb3   :  { %v363_v23 = vpop.permute.xlu1 %362  ;;  %v357_v33 = vpop.permute.xlu0 %356 }
  0xb4   :  { %v361_v57 = vsel %vm151_vm7, %v355_v30, %v357_v33  ;;  %v451_v12 = vsel %vm208_vm5, %v441_v11, %v363_v23 }
  0xb5   :  { %v449_v56 = vsel %vm199_vm3, %v439_v2, %v361_v57 }
  0xb7   :  { %v367_v47 = vpop.permute.xlu1 %366  ;;  %v365_v48 = vpop.permute.xlu0 %364 }
  0xb8   :  { %v372_v49 = vsel %vm166_vm9, %v363_v23, %v365_v48  ;;  %v373_v50 = vsel %vm166_vm9, %v365_v48, %v367_v47 }
  0xb9   :  { %v455_v58 = vsel %vm208_vm5, %v445_v51, %v373_v50  ;;  %v453_v60 = vsel %vm208_vm5, %v443_v54, %v372_v49 }
  0xba   :  { %484 = vrot.lane.b32.xlu1 %v455_v58, %s775_s25  ;;  %482 = vrot.lane.b32.xlu0 %v453_v60, %s775_s25 }
  0xbb   :  { %v371_v3 = vpop.permute.xlu1 %370  ;;  %v369_v4 = vpop.permute.xlu0 %368 }
  0xbc   :  { %v374_v5 = vsel %vm166_vm9, %v367_v47, %v369_v4  ;;  %v375_v6 = vsel %vm166_vm9, %v369_v4, %v371_v3 }
  0xbd   :  { %v459_v55 = vsel %vm208_vm5, %v449_v56, %v375_v6  ;;  %v457_v63 = vsel %vm208_vm5, %v447_v7, %v374_v5 }
  0xbe   :  { %488 = vrot.lane.b32.xlu1 %v459_v55, %s775_s25  ;;  %486 = vrot.lane.b32.xlu0 %v457_v63, %s775_s25 }
  0xbf   :  { %v379_v9 = vpop.permute.xlu1 %378  ;;  %v377_v10 = vpop.permute.xlu0 %376 }
  0xc0   :  { %v386_v19 = vsel %vm181_vm10, %v377_v10, %v379_v9 }
  0xc2   :  { %490 = vrot.lane.b32.xlu1 %v377_v10, %s775_s25  ;;  %480 = vrot.lane.b32.xlu0 %v451_v12, %s775_s25 }
  0xc3   :  { %v383_v13 = vpop.permute.xlu1 %382  ;;  %v381_v17 = vpop.permute.xlu0 %380 }
  0xc4   :  { %v387_v18 = vsel %vm181_vm10, %v379_v9, %v381_v17  ;;  %v388_v21 = vsel %vm181_vm10, %v381_v17, %v383_v13 }
  0xc6   :  { %494 = vrot.lane.b32.xlu1 %v387_v18, %s775_s25  ;;  %492 = vrot.lane.b32.xlu0 %v386_v19, %s775_s25 }
  0xc7   :  { %v385_v53 = vpop.permute.xlu0 %384  ;;  %v64_v62 = vpop.permute.xlu1 %63 }
  0xc8   :  { %v389_v20 = vsel %vm181_vm10, %v383_v13, %v385_v53 }
  0xca   :  { %498 = vrot.lane.b32.xlu1 %v389_v20, %s775_s25  ;;  %496 = vrot.lane.b32.xlu0 %v388_v21, %s775_s25 }
  0xcb   :  { %v66_v22 = vpop.permute.xlu0 %65  ;;  %v68_v24 = vpop.permute.xlu1 %67 }
  0xcc   :  { %v73_v29 = vsel %vm71_vm0, %v64_v62, %v66_v22  ;;  %v74_v23 = vsel %vm71_vm0, %v66_v22, %v68_v24  ;;  %v75_v35 = vsel %vm71_vm0, %v68_v24, %v960_v41 }
  0xcd   :  { %v192_v33 = vsel %vm186_vm4, %v908_v32, %v73_v29  ;;  %v195_v36 = vsel %vm186_vm4, %v807_v15, %v74_v23  ;;  %v198_v15 = vsel %vm186_vm4, %v943_v37, %v75_v35 }
  0xce   :  { %525 = vperm.xlu0 %759, %v522_v25  }
  0xcf   :  { %v62_v26 = vpop.permute.xlu0 %61  ;;  %v82_v27 = vpop.permute.xlu1 %81 }
  0xd0   :  { %v72_v40 = vsel %vm71_vm0, %v62_v26, %v64_v62 }
  0xd1   :  { %v189_v47 = vsel %vm186_vm4, %v805_v14, %v72_v40 }
  0xd3   :  { %v86_v28 = vpop.permute.xlu1 %85  ;;  %v84_v16 = vpop.permute.xlu0 %83 }
  0xd4   :  { %v91_v34 = vsel %vm89_vm1, %v82_v27, %v84_v16  ;;  %v92_v42 = vsel %vm89_vm1, %v84_v16, %v86_v28  ;;  %v93_v32 = vsel %vm89_vm1, %v86_v28, %v973_v46 }
  0xd5   :  { %v203_v44 = vsel %vm199_vm3, %v192_v33, %v91_v34  ;;  %v205_v51 = vsel %vm199_vm3, %v195_v36, %v92_v42  ;;  %v207_v57 = vsel %vm199_vm3, %v198_v15, %v93_v32 }
  0xd7   :  { %v99_v30 = vpop.permute.xlu1 %98  ;;  %v80_v31 = vpop.permute.xlu0 %79 }
  0xd8   :  { %v90_v45 = vsel %vm89_vm1, %v80_v31, %v82_v27 }
  0xd9   :  { %v201_v52 = vsel %vm199_vm3, %v189_v47, %v90_v45 }
  0xdb   :  { %v103_v38 = vpop.permute.xlu1 %102  ;;  %v101_v39 = vpop.permute.xlu0 %100 }
  0xdc   :  { %v108_v43 = vsel %vm106_vm2, %v99_v30, %v101_v39  ;;  %v109_v48 = vsel %vm106_vm2, %v101_v39, %v103_v38 }
  0xdd   :  { %v213_v41 = vsel %vm208_vm5, %v203_v44, %v108_v43  ;;  %v216_v14 = vsel %vm208_vm5, %v205_v51, %v109_v48 }
  0xde   :  { %556 = vmatprep.subr.bf16.mxu0 %v213_v41 }
  0xdf   :  { %v97_v49 = vpop.permute.xlu1 %96  ;;  %v105_v50 = vpop.permute.xlu0 %104 }
  0xe0   :  { %v107_v54 = vsel %vm106_vm2, %v97_v49, %v99_v30  ;;  %v110_v46 = vsel %vm106_vm2, %v103_v38, %v105_v50 }
  0xe1   :  { %v210_v58 = vsel %vm208_vm5, %v201_v52, %v107_v54  ;;  %v219_v37 = vsel %vm208_vm5, %v207_v57, %v110_v46  ;;  %v521_v46 = vld [vmem:[%s1230_s1] sm:$0xf] }
  0xe2   :  { %557 = vmatpush1.bf16.msra.mxu0 %v210_v58  ;;  %597 = vmatprep.subr.bf16.mxu1 %v219_v37 }
  0xe3   :  { %v116_v60 = vpop.permute.xlu1 %115  ;;  %v114_v61 = vpop.permute.xlu0 %113  ;;  %598 = vmatpush1.bf16.msra.mxu1 %v216_v14 }
  0xe4   :  { %v123_v11 = vsel %vm121_vm8, %v114_v61, %v116_v60 }
  0xe7   :  { %v120_v0 = vpop.permute.xlu1 %119  ;;  %v118_v1 = vpop.permute.xlu0 %117 }
  0xe8   :  { %v125_v18 = vsel %vm121_vm8, %v118_v1, %v120_v0  ;;  %v124_v26 = vsel %vm121_vm8, %v116_v60, %v118_v1 }
  0xeb   :  { %v131_v2 = vpop.permute.xlu1 %130  ;;  %v129_v3 = vpop.permute.xlu0 %128 }
  0xec   :  { %v138_v12 = vsel %vm136_vm6, %v129_v3, %v131_v2 }
  0xed   :  { %v226_v19 = vsel %vm186_vm4, %v123_v11, %v138_v12 }
  0xef   :  { %v135_v4 = vpop.permute.xlu1 %134  ;;  %v133_v5 = vpop.permute.xlu0 %132 }
  0xf0   :  { %v140_v21 = vsel %vm136_vm6, %v133_v5, %v135_v4  ;;  %v139_v27 = vsel %vm136_vm6, %v131_v2, %v133_v5 }
  0xf1   :  { %v232_v23 = vsel %vm186_vm4, %v125_v18, %v140_v21  ;;  %v229_v38 = vsel %vm186_vm4, %v124_v26, %v139_v27 }
  0xf3   :  { %v127_v6 = vpop.permute.xlu1 %126  ;;  %v112_v56 = vpop.permute.xlu0 %111 }
  0xf4   :  { %v137_v53 = vsel %vm136_vm6, %v127_v6, %v129_v3  ;;  %v122_v62 = vsel %vm121_vm8, %v112_v56, %v114_v61 }
  0xf5   :  { %v223_v29 = vsel %vm186_vm4, %v122_v62, %v137_v53 }
  0xf7   :  { %v146_v7 = vpop.permute.xlu1 %145  ;;  %v144_v55 = vpop.permute.xlu0 %143 }
  0xf8   :  { %v153_v13 = vsel %vm151_vm7, %v144_v55, %v146_v7 }
  0xf9   :  { %v236_v25 = vsel %vm199_vm3, %v226_v19, %v153_v13 }
  0xfb   :  { %v150_v63 = vpop.permute.xlu1 %149  ;;  %v148_v8 = vpop.permute.xlu0 %147 }
  0xfc   :  { %v155_v28 = vsel %vm151_vm7, %v148_v8, %v150_v63  ;;  %v154_v30 = vsel %vm151_vm7, %v146_v7, %v148_v8 }
  0xfd   :  { %v240_v42 = vsel %vm199_vm3, %v232_v23, %v155_v28  ;;  %v238_v44 = vsel %vm199_vm3, %v229_v38, %v154_v30 }
  0xff   :  { %v159_v9 = vpop.permute.xlu1 %158  ;;  %v142_v10 = vpop.permute.xlu0 %141 }
 0x100   :  { %v152_v22 = vsel %vm151_vm7, %v142_v10, %v144_v55 }
 0x101   :  { %v234_v36 = vsel %vm199_vm3, %v223_v29, %v152_v22 }
 0x103   :  { %v163_v17 = vpop.permute.xlu1 %162  ;;  %v161_v20 = vpop.permute.xlu0 %160 }
 0x104   :  { %v168_v24 = vsel %vm166_vm9, %v159_v9, %v161_v20  ;;  %v169_v33 = vsel %vm166_vm9, %v161_v20, %v163_v17 }
 0x105   :  { %v245_v16 = vsel %vm208_vm5, %v236_v25, %v168_v24  ;;  %v248_v45 = vsel %vm208_vm5, %v238_v44, %v169_v33 }
 0x106   :  { %558 = vmatprep.subr.bf16.mxu0 %v245_v16 }
 0x107   :  { %v157_v31 = vpop.permute.xlu1 %156  ;;  %v165_v35 = vpop.permute.xlu0 %164 }
 0x108   :  { %v167_v34 = vsel %vm166_vm9, %v157_v31, %v159_v9  ;;  %v170_v39 = vsel %vm166_vm9, %v163_v17, %v165_v35 }
 0x109   :  { %v242_v40 = vsel %vm208_vm5, %v234_v36, %v167_v34  ;;  %v251_v43 = vsel %vm208_vm5, %v240_v42, %v170_v39 }
 0x10a   :  { %559 = vmatpush1.bf16.msra.mxu0 %v242_v40  ;;  %599 = vmatprep.subr.bf16.mxu1 %v251_v43 }
 0x10b   :  { %v174_v32 = vpop.permute.xlu1 %173  ;;  %v172_v41 = vpop.permute.xlu0 %171  ;;  %600 = vmatpush1.bf16.msra.mxu1 %v248_v45 }
 0x10c   :  { %v182_v15 = vsel %vm181_vm10, %v172_v41, %v174_v32 }
 0x10d   :  { %v533_v49 = vsel %vm186_vm4, %v182_v15, 0 }
 0x10f   :  { %v178_v47 = vpop.permute.xlu1 %177  ;;  %v176_v48 = vpop.permute.xlu0 %175 }
 0x110   :  { %v183_v50 = vsel %vm181_vm10, %v174_v32, %v176_v48  ;;  %v184_v51 = vsel %vm181_vm10, %v176_v48, %v178_v47 }
 0x111   :  { %740 = vmatprep.subr.msk.bf16.mxu0 %vm186_vm4, %v183_v50  ;;  %v539_v57 = vsel %vm186_vm4, %v184_v51, 0 }
 0x112   :  { %561 = vmatpush1.bf16.msra.mxu0 %v533_v49 }
 0x113   :  { %v473_v54 = vpop.permute.xlu1 %472  ;;  %v180_v52 = vpop.permute.xlu0 %179 }
 0x114   :  { %v185_v58 = vsel %vm181_vm10, %v178_v47, %v180_v52 }
 0x115   :  { %742 = vmatprep.subr.msk.bf16.mxu1 %vm186_vm4, %v185_v58  ;;  %741 = vmatmul.mubr.msk.bf16.vlgmr.msra.gmra.mrb[0].mxu0 %vm528_vm11, %v521_v46 }
 0x116   :  { %602 = vmatpush1.bf16.msra.mxu1 %v539_v57  ;;  %670 = vmatprep.mubr.bf16.mxu0 %v774_v59 }
 0x117   :  { %v477_v37 = vpop.permute.xlu1 %476  ;;  %v475_v14 = vpop.permute.xlu0 %474 }
 0x118   :  { %v502_v60 = vsel %vm500_vm12, %v473_v54, %v475_v14  ;;  %v503_v3 = vsel %vm500_vm12, %v475_v14, %v477_v37 }
 0x119   :  { %638 = vmatprep.subr.bf16.mxu0 %v502_v60  ;;  %743 = vmatmul.mubr.msk.bf16.vlgmr.msra.gmra.mrb[0].mxu1 %vm528_vm11, %v521_v46 }
 0x11a   :  { %711 = vmatprep.mubr.bf16.mxu1 %v774_v59 }
 0x11b   :  { %v471_v61 = vpop.permute.xlu1 %470  ;;  %v479_v1 = vpop.permute.xlu0 %478 }
 0x11c   :  { %v501_v0 = vsel %vm500_vm12, %v471_v61, %v473_v54  ;;  %v504_v2 = vsel %vm500_vm12, %v477_v37, %v479_v1 }
 0x11d   :  { %639 = vmatpush1.bf16.msra.mxu0 %v501_v0  ;;  %679 = vmatprep.subr.bf16.mxu1 %v504_v2 }
 0x11e   :  { %680 = vmatpush1.bf16.msra.mxu1 %v503_v3 }
 0x12c   :  { %v485_v4 = vpop.permute.xlu1 %484  ;;  %v483_v5 = vpop.permute.xlu0 %482 }
 0x12d   :  { %v506_v6 = vsel %vm500_vm12, %v483_v5, %v485_v4 }
 0x12e   :  { %640 = vmatprep.subr.bf16.mxu0 %v506_v6 }
 0x130   :  { %v489_v56 = vpop.permute.xlu1 %488  ;;  %v487_v7 = vpop.permute.xlu0 %486 }
 0x131   :  { %v507_v55 = vsel %vm500_vm12, %v485_v4, %v487_v7  ;;  %v508_v59 = vsel %vm500_vm12, %v487_v7, %v489_v56 }
 0x132   :  { %681 = vmatprep.subr.bf16.mxu1 %v508_v59 }
 0x133   :  { %682 = vmatpush1.bf16.msra.mxu1 %v507_v55 }
 0x134   :  { %v491_v63 = vpop.permute.xlu1 %490  ;;  %v481_v8 = vpop.permute.xlu0 %480 }
 0x135   :  { %v505_v9 = vsel %vm500_vm12, %v481_v8, %v483_v5 }
 0x136   :  { %641 = vmatpush1.bf16.msra.mxu0 %v505_v9 }
 0x138   :  { %v495_v10 = vpop.permute.xlu1 %494  ;;  %v493_v11 = vpop.permute.xlu0 %492 }
 0x139   :  { %v509_v12 = vsel %vm500_vm12, %v491_v63, %v493_v11  ;;  %v510_v13 = vsel %vm500_vm12, %v493_v11, %v495_v10 }
 0x13a   :  { %v545_v17 = vsel %vm186_vm4, %v509_v12, 0  ;;  %744 = vmatprep.subr.msk.bf16.mxu0 %vm186_vm4, %v510_v13 }
 0x13b   :  { %643 = vmatpush1.bf16.msra.mxu0 %v545_v17 }
 0x13c   :  { %v499_v18 = vpop.permute.xlu1 %498  ;;  %v497_v19 = vpop.permute.xlu0 %496 }
 0x13d   :  { %v511_v53 = vsel %vm500_vm12, %v495_v10, %v497_v19  ;;  %v512_v62 = vsel %vm500_vm12, %v497_v19, %v499_v18 }
 0x13e   :  { %v551_v20 = vsel %vm186_vm4, %v511_v53, 0  ;;  %746 = vmatprep.subr.msk.bf16.mxu1 %vm186_vm4, %v512_v62  ;;  %745 = vmatmul.mubr.msk.bf16.vlgmr.msra.gmra.mrb[4].mxu0 %vm528_vm11, %v521_v46 }
 0x13f   :  { %684 = vmatpush1.bf16.msra.mxu1 %v551_v20 }
 0x142   :  { %747 = vmatmul.mubr.msk.bf16.vlgmr.msra.gmra.mrb[4].mxu1 %vm528_vm11, %v521_v46 }
 0x14d   :  { %v526_v21 = vpop.permute.xlu0 %525 }
 0x1e8   :  { %v590_v22 = vpop.f32.mrb[0].mxu0 }
 0x1e9   :  { %v592_v24 = vpop.f32.mrb[1].mxu0  ;;  %v591_v25 = vadd.f32 %v590_v22, %v526_v21 }
 0x1ea   :  { %v594_v26 = vpop.f32.mrb[2].mxu0  ;;  %v593_v27 = vadd.f32 %v592_v24, %v526_v21 }
 0x1eb   :  { %v595_v28 = vpop.f32.mrb[3].mxu0  ;;  %v720_v16 = vmax.f32 %v591_v25, 0.0 }
 0x1ec   :  { %v631_v29 = vpop.f32.mrb[0].mxu1  ;;  %v721_v30 = vmax.f32 %v593_v27, 0.0 }
 0x1ed   :  { %v633_v31 = vpop.f32.mrb[1].mxu1  ;;  %v632_v23 = vadd.f32 %v631_v29, %v526_v21  ;;  %728 = vst [vmem:[%s1231_s3] sm:$0xff] %v720_v16 }
 0x1ee   :  { %v635_v33 = vpop.f32.mrb[2].mxu1  ;;  %v634_v34 = vadd.f32 %v633_v31, %v526_v21  ;;  %729 = vst [vmem:[%s1231_s3 + $0x8] sm:$0xff] %v721_v30 }
 0x1ef   :  { %v722_v35 = vmax.f32 %v632_v23, 0.0  ;;  %v636_v36 = vpop.f32.mrb[3].mxu1 }
 0x1f0   :  { %v723_v38 = vmax.f32 %v634_v34, 0.0 }
 0x1f1   :  { %730 = vst [vmem:[%s1231_s3 + $0x10] sm:$0xff] %v722_v35 }
 0x1f2   :  { %731 = vst [vmem:[%s1231_s3 + $0x18] sm:$0xff] %v723_v38 }
 0x211   :  { %v672_v39 = vpop.f32.mrb[4].mxu0 }
 0x212   :  { %v673_v40 = vadd.f32 %v672_v39, %v526_v21  ;;  %v674_v42 = vpop.f32.mrb[5].mxu0 }
 0x213   :  { %v675_v43 = vadd.f32 %v674_v42, %v526_v21  ;;  %v676_v44 = vpop.f32.mrb[6].mxu0 }
 0x214   :  { %v724_v32 = vmax.f32 %v673_v40, 0.0  ;;  %v677_v45 = vpop.f32.mrb[7].mxu0 }
 0x215   :  { %v725_v41 = vmax.f32 %v675_v43, 0.0  ;;  %v713_v15 = vpop.f32.mrb[4].mxu1 }
 0x216   :  { %732 = vst [vmem:[%s1231_s3 + $0x20] sm:$0xff] %v724_v32  ;;  %v714_v47 = vadd.f32 %v713_v15, %v526_v21  ;;  %v715_v48 = vpop.f32.mrb[5].mxu1 }
 0x217   :  { %733 = vst [vmem:[%s1231_s3 + $0x28] sm:$0xff] %v725_v41  ;;  %v716_v49 = vadd.f32 %v715_v48, %v526_v21  ;;  %v717_v50 = vpop.f32.mrb[6].mxu1 }
 0x218   :  { %v726_v51 = vmax.f32 %v714_v47, 0.0  ;;  %v718_v54 = vpop.f32.mrb[7].mxu1 }
 0x219   :  { %v727_v46 = vmax.f32 %v716_v49, 0.0 }
 0x21a   :  { %734 = vst [vmem:[%s1231_s3 + $0x30] sm:$0xff] %v726_v51 }
 0x21b   :  { %735 = vst [vmem:[%s1231_s3 + $0x38] sm:$0xff] %v727_v46 }

</bundles_post_ra>
